<compile_context>
chip_gen: v6e
topology: v6e:2x2x1
jax: 0.10.0
libtpu: 0.0.40
codegen_flags: <defaults>
</compile_context>

<pallas_src>
import math
import functools

import jax
import jax.numpy as jnp
from jax.experimental import pallas as pl
from jax.experimental.pallas import tpu as pltpu


def _round_up(x, m):
    return -(-x // m) * m


def _tpu_vmem_capacity_bytes():
    """Per-core VMEM (128 MiB v5e/v6e, 64 MiB v7x); conservative fallback."""
    try:
        return int(pltpu.get_tpu_info().vmem_capacity_bytes)
    except Exception:
        return 64 * 1024 * 1024


def _ffn_kernel(x_ref, w13_ref, b13_ref, w2t_ref, b2_ref, o_ref, acc_ref, *, th):
    h = pl.program_id(1)
    n_h = pl.num_programs(1)

    # b2 folded into the accumulator init (saves one (tm, Dp) VPU add / tile).
    @pl.when(h == 0)
    def _():
        acc_ref[...] = jnp.broadcast_to(
            b2_ref[...].astype(jnp.float32), acc_ref.shape)

    # Fused first projection: x @ [W1^T | W3^T]_h  (bf16 MXU, f32 accumulate).
    h13 = jnp.dot(x_ref[...], w13_ref[...],
                  preferred_element_type=jnp.float32)
    h13 = h13 + b13_ref[...].astype(jnp.float32)   # biases kept in f32

    h1 = h13[:, :th]                      # sw1' already folded into w13/b13
    h3 = h13[:, th:]                      # sw3' already folded into w13/b13
    g = (h1 * jax.nn.sigmoid(h1)) * h3    # SiLU + gate, f32 (VPU/EUP)

    # Second projection: accumulate this hidden slice's (tm, Dp) contribution.
    acc_ref[...] += jnp.dot(g.astype(w2t_ref.dtype), w2t_ref[...],
                            preferred_element_type=jnp.float32)

    @pl.when(h == n_h - 1)
    def _():
        o_ref[...] = acc_ref[...].astype(o_ref.dtype)


def prepare_ffn_params(params, *, emb_dim, hidden_dim,
                       sw_init_value=1.0, sw_init_scaling=1.0,
                       compute_dtype=jnp.bfloat16, th=None,
                       vmem_limit_bytes=None):
    """One-time (per parameter set) repack. Keep this OUT of the per-call path.

    Folds sw1'/sw3' into a fused [W1^T | W3^T] weight/bias, pads the embedding
    dim to a lane-dense multiple of 128, and casts the MXU operands to
    `compute_dtype` (bf16 default -> native MXU fast path on all generations).
    """
    D, H = emb_dim, hidden_dim
    Dp = max(128, _round_up(D, 128))
    cbytes = jnp.dtype(compute_dtype).itemsize

    cap = _tpu_vmem_capacity_bytes()
    if vmem_limit_bytes is None:
        vmem_limit_bytes = min(96 << 20, max(cap - (12 << 20), 32 << 20))

    if th is None:
        # Single whole-H step if the (double-buffered) weights fit comfortably
        # in half the VMEM budget; otherwise tile (512/256/128 preferred).
        total_w_bytes = (Dp * 2 * H + H * Dp) * cbytes
        if H % 128 == 0 and 2 * total_w_bytes <= vmem_limit_bytes // 2:
            th = H
        else:
            th = H
            for cand in (512, 256, 128):
                if H >= cand and H % cand == 0:
                    th = cand
                    break
    assert H % th == 0, "hidden_dim must be divisible by th"
    # NOTE: th not a multiple of 128 makes the h1/h3 lane slices cross vreg
    # tile boundaries (relayout copies) -- correct but slow.
    n_h = H // th

    f32 = jnp.float32
    sw1_eff = params["sw1"].astype(f32) * (
        sw_init_value / sw_init_scaling * math.sqrt(D))
    sw3_eff = params["sw3"].astype(f32) * (sw_init_value / sw_init_scaling)

    w1t = params["w1_w"].astype(f32).T * sw1_eff[None, :]      # (D, H), scaled cols
    w3t = params["w3_w"].astype(f32).T * sw3_eff[None, :]      # (D, H)
    if Dp != D:                                                # lane-dense pad
        w1t = jnp.pad(w1t, ((0, Dp - D), (0, 0)))
        w3t = jnp.pad(w3t, ((0, Dp - D), (0, 0)))
    # Per-h contiguous (Dp, 2*th) blocks: [W1^T_h | W3^T_h].
    w13 = jnp.concatenate(
        [w1t.reshape(Dp, n_h, th).transpose(1, 0, 2),
         w3t.reshape(Dp, n_h, th).transpose(1, 0, 2)], axis=-1
    ).astype(compute_dtype)                                    # (n_h, Dp, 2*th)
    b13 = jnp.concatenate(
        [(params["w1_b"].astype(f32) * sw1_eff).reshape(n_h, 1, th),
         (params["w3_b"].astype(f32) * sw3_eff).reshape(n_h, 1, th)],
        axis=-1)                                               # (n_h, 1, 2*th) f32

    w2t = params["w2_w"].astype(f32).T                         # (H, D)
    b2 = params["w2_b"].astype(f32).reshape(1, D)
    if Dp != D:
        w2t = jnp.pad(w2t, ((0, 0), (0, Dp - D)))
        b2 = jnp.pad(b2, ((0, 0), (0, Dp - D)))
    w2t = w2t.astype(compute_dtype)

    return dict(w13=w13, b13=b13, w2t=w2t, b2=b2,
                emb_dim=D, emb_dim_padded=Dp, hidden_dim=H, th=th, n_h=n_h,
                compute_dtype=compute_dtype,
                out_dtype=params["w2_w"].dtype,
                vmem_limit_bytes=vmem_limit_bytes, vmem_capacity=cap)


def normalized_feed_forward(x, prep, *, tm=None):
    """x: (..., emb_dim).  Returns same leading shape, last dim emb_dim."""
    D = prep["emb_dim"]
    Dp = prep["emb_dim_padded"]
    th = prep["th"]
    n_h = prep["n_h"]
    cdt = prep["compute_dtype"]
    cbytes = jnp.dtype(cdt).itemsize
    obytes = jnp.dtype(prep["out_dtype"]).itemsize
    vmem_limit = prep["vmem_limit_bytes"]
    cap = prep["vmem_capacity"]

    orig_shape = x.shape
    x2d = x.reshape(-1, D)
    T = x2d.shape[0]

    # --- token tiling: multiple of the sublane pack for the compute dtype ----
    sub = {1: 32, 2: 16, 4: 8}.get(cbytes, 8)
    tm_cap = _round_up(max(T, sub), sub)
    if tm is None:
        # 128 MiB parts (v5e/v6e) afford big token tiles (amortise the
        # re-streamed weights); 64 MiB parts (v7x) cap lower.
        tm = 1024 if cap >= (96 << 20) else 512
    tm = max(sub, (min(tm, tm_cap) // sub) * sub)

    # Shrink tm until the (double-buffered) working set fits the VMEM budget.
    def _vmem_est(tm_):
        return (2 * tm_ * Dp * cbytes            # x (2 bufs)
                + 2 * Dp * 2 * th * cbytes       # w13 (2 bufs)
                + 2 * 2 * th * 4                 # b13
                + 2 * th * Dp * cbytes           # w2t (2 bufs)
                + 2 * Dp * 4                     # b2
                + 2 * tm_ * Dp * obytes          # out (2 bufs)
                + tm_ * Dp * 4                   # f32 accumulator scratch
                + 2 * tm_ * 2 * th * 4)          # h13/g f32 temporaries

    budget = int(vmem_limit * 0.75)
    while tm > sub and _vmem_est(tm) > budget:
        tm = max(sub, ((tm // 2) // sub) * sub)

    n_i = -(-T // tm)                            # ceil-div; remainder padded
    T_pad = n_i * tm
    if T_pad != T or Dp != D:
        x2d = jnp.pad(x2d, ((0, T_pad - T), (0, Dp - D)))
    x2d = x2d.astype(cdt)

    kernel = functools.partial(_ffn_kernel, th=th)

    out = pl.pallas_call(
        kernel,
        out_shape=jax.ShapeDtypeStruct((T_pad, Dp), prep["out_dtype"]),
        grid_spec=pltpu.PrefetchScalarGridSpec(
            num_scalar_prefetch=0,
            grid=(n_i, n_h),
            in_specs=[
                pl.BlockSpec((tm, Dp), lambda i, h: (i, 0)),              # x tile
                pl.BlockSpec((None, Dp, 2 * th), lambda i, h: (h, 0, 0)),  # [W1|W3]^T
                pl.BlockSpec((None, 1, 2 * th), lambda i, h: (h, 0, 0)),   # [b1|b3]
                pl.BlockSpec((th, Dp), lambda i, h: (h, 0)),               # W2^T slice
                pl.BlockSpec((1, Dp), lambda i, h: (0, 0)),                # b2
            ],
            out_specs=pl.BlockSpec((tm, Dp), lambda i, h: (i, 0)),
            scratch_shapes=[pltpu.VMEM((tm, Dp), jnp.float32)],            # f32 acc
        ),
        compiler_params=pltpu.CompilerParams(
            dimension_semantics=("parallel", "arbitrary"),
            vmem_limit_bytes=vmem_limit),
    )(x2d, prep["w13"], prep["b13"], prep["w2t"], prep["b2"])

    out = out[:T, :D]
    return out.reshape(orig_shape[:-1] + (D,))


def _reference(x, params, *, emb_dim, sw_init_value=1.0, sw_init_scaling=1.0):
    """Pure-JAX f32 reference mirroring the PyTorch forward."""
    sqrt_d = math.sqrt(emb_dim)
    h1 = x @ params["w1_w"].T + params["w1_b"]
    h3 = x @ params["w3_w"].T + params["w3_b"]
    sw1 = params["sw1"] * (sw_init_value / sw_init_scaling * sqrt_d)
    sw3 = params["sw3"] * (sw_init_value / sw_init_scaling)
    a = sw1 * h1
    g = (a * jax.nn.sigmoid(a)) * (sw3 * h3)
    return g @ params["w2_w"].T + params["w2_b"]


if __name__ == "__main__":
    # cfg: emb_dim=32, hidden_dim=256, dtype=float32 (module defaults for sw_*).
    emb_dim = 32
    hidden_dim = 256
    batch, seq = 2, 16
    dtype = jnp.float32
    sw_init_value = 1.0
    sw_init_scaling = 1.0

    key = jax.random.PRNGKey(0)
    kx, k1, k2, k3, kb1, kb2, kb3 = jax.random.split(key, 7)

    scale1 = 1.0 / math.sqrt(emb_dim)
    scale2 = 1.0 / math.sqrt(hidden_dim)
    params = {
        "w1_w": jax.random.uniform(k1, (hidden_dim, emb_dim), dtype,
                                   minval=-scale1, maxval=scale1),
        "w1_b": jax.random.uniform(kb1, (hidden_dim,), dtype,
                                   minval=-scale1, maxval=scale1),
        "w2_w": jax.random.uniform(k2, (emb_dim, hidden_dim), dtype,
                                   minval=-scale2, maxval=scale2),
        "w2_b": jax.random.uniform(kb2, (emb_dim,), dtype,
                                   minval=-scale2, maxval=scale2),
        "w3_w": jax.random.uniform(k3, (hidden_dim, emb_dim), dtype,
                                   minval=-scale1, maxval=scale1),
        "w3_b": jax.random.uniform(kb3, (hidden_dim,), dtype,
                                   minval=-scale1, maxval=scale1),
        # reset_parameters(): ones * sw_init_scaling
        "sw1": jnp.ones((hidden_dim,), dtype) * sw_init_scaling,
        "sw3": jnp.ones((hidden_dim,), dtype) * sw_init_scaling,
    }

    x = jax.random.normal(kx, (batch, seq, emb_dim), dtype)
    ref = _reference(x, params, emb_dim=emb_dim,
                     sw_init_value=sw_init_value,
                     sw_init_scaling=sw_init_scaling)

    # 1) bf16 MXU fast path, auto tile selection (th == H here -> single
    #    reduction step, weights effectively resident).
    prep_bf16 = prepare_ffn_params(
        params, emb_dim=emb_dim, hidden_dim=hidden_dim,
        sw_init_value=sw_init_value, sw_init_scaling=sw_init_scaling,
        compute_dtype=jnp.bfloat16)
    out_bf16 = jax.block_until_ready(normalized_feed_forward(x, prep_bf16))
    assert out_bf16.shape == (batch, seq, emb_dim)
    assert jnp.allclose(out_bf16, ref, atol=5e-2, rtol=5e-2), \
        "bf16 path mismatch vs reference"

    # 2) bf16 path, explicit th=128 and tm=16 -> exercises the multi-step
    #    hidden-reduction (accumulator) axis and a multi-tile token axis.
    prep_bf16_th = prepare_ffn_params(
        params, emb_dim=emb_dim, hidden_dim=hidden_dim,
        sw_init_value=sw_init_value, sw_init_scaling=sw_init_scaling,
        compute_dtype=jnp.bfloat16, th=128)
    out_bf16_th = jax.block_until_ready(
        normalized_feed_forward(x, prep_bf16_th, tm=16))
    assert jnp.allclose(out_bf16_th, ref, atol=5e-2, rtol=5e-2), \
        "bf16 tiled path mismatch vs reference"

    # 3) f32 compute path (matches the module dtype exactly) -> strict check.
    prep_f32 = prepare_ffn_params(
        params, emb_dim=emb_dim, hidden_dim=hidden_dim,
        sw_init_value=sw_init_value, sw_init_scaling=sw_init_scaling,
        compute_dtype=jnp.float32, th=128)
    out_f32 = jax.block_until_ready(
        normalized_feed_forward(x, prep_f32, tm=8))
    assert jnp.allclose(out_f32, ref, atol=1e-4, rtol=1e-4), \
        "f32 path mismatch vs reference"

    print("KERNEL_OK")
</pallas_src>

<mosaic_0001>
module attributes {stable_mosaic.version = 11 : i64} {
  func.func @_ffn_kernel(%arg0: i32, %arg1: i32, %arg2: memref<32x128xbf16, #tpu.memory_space<vmem>>, %arg3: memref<1x128x512xbf16, #tpu.memory_space<vmem>>, %arg4: memref<1x1x512xf32, #tpu.memory_space<vmem>>, %arg5: memref<256x128xbf16, #tpu.memory_space<vmem>>, %arg6: memref<1x128xf32, #tpu.memory_space<vmem>>, %arg7: memref<32x128xf32, #tpu.memory_space<vmem>>, %arg8: memref<32x128xf32, #tpu.memory_space<vmem>>) attributes {dimension_semantics = [#tpu.dimension_semantics<parallel>, #tpu.dimension_semantics<arbitrary>], iteration_bounds = array<i64: 1, 1>, scalar_prefetch = 0 : i64, scratch_operands = 1 : i64, tpu.core_type = #tpu.core_type<tc>, window_params = [{transform_indices = @transform_0, window_bounds = array<i64: 32, 128>}, {transform_indices = @transform_1, window_bounds = array<i64: 1, 128, 512>}, {transform_indices = @transform_2, window_bounds = array<i64: 1, 1, 512>}, {transform_indices = @transform_3, window_bounds = array<i64: 256, 128>}, {pipeline_mode = #tpu.pipeline_mode<synchronous>, transform_indices = @transform_4, window_bounds = array<i64: 1, 128>}, {transform_indices = @transform_5, window_bounds = array<i64: 32, 128>}]} {
    %c0_i32 = arith.constant 0 : i32
    %0 = arith.cmpi eq, %arg1, %c0_i32 : i32
    %1 = arith.extui %0 : i1 to i32
    %c0_i32_0 = arith.constant 0 : i32
    %2 = arith.cmpi ne, %1, %c0_i32_0 : i32
    scf.if %2 {
      %c0_18 = arith.constant 0 : index
      %c0_19 = arith.constant 0 : index
      %29 = vector.load %arg6[%c0_18, %c0_19] : memref<1x128xf32, #tpu.memory_space<vmem>>, vector<1x128xf32>
      %30 = vector.shape_cast %29 : vector<1x128xf32> to vector<1x128xf32>
      %31 = vector.broadcast %30 : vector<1x128xf32> to vector<32x128xf32>
      %c0_20 = arith.constant 0 : index
      %c0_21 = arith.constant 0 : index
      %32 = vector.load %arg8[%c0_20, %c0_21] : memref<32x128xf32, #tpu.memory_space<vmem>>, vector<32x128xf32>
      tpu.vector_store %arg8[%c0_20, %c0_21], %31 {strides = array<i32>} : memref<32x128xf32, #tpu.memory_space<vmem>>, vector<32x128xf32>,
    } else {
    }
    %c0 = arith.constant 0 : index
    %c0_1 = arith.constant 0 : index
    %3 = vector.load %arg2[%c0, %c0_1] : memref<32x128xbf16, #tpu.memory_space<vmem>>, vector<32x128xbf16>
    %c0_2 = arith.constant 0 : index
    %c0_3 = arith.constant 0 : index
    %c0_4 = arith.constant 0 : index
    %4 = vector.load %arg3[%c0_2, %c0_3, %c0_4] : memref<1x128x512xbf16, #tpu.memory_space<vmem>>, vector<1x128x512xbf16>
    %5 = vector.shape_cast %4 : vector<1x128x512xbf16> to vector<128x512xbf16>
    %cst = arith.constant dense<0.000000e+00> : vector<32x512xf32>
    %6 = tpu.matmul %3, %5, %cst {dimension_numbers = #tpu.dot_dimension_numbers<[1], [0], [0], [1], [0, 0, 1, 1], [], []>} : vector<32x128xbf16>, vector<128x512xbf16>, vector<32x512xf32> -> vector<32x512xf32>
    %c0_5 = arith.constant 0 : index
    %c0_6 = arith.constant 0 : index
    %c0_7 = arith.constant 0 : index
    %7 = vector.load %arg4[%c0_5, %c0_6, %c0_7] : memref<1x1x512xf32, #tpu.memory_space<vmem>>, vector<1x1x512xf32>
    %8 = vector.shape_cast %7 : vector<1x1x512xf32> to vector<1x512xf32>
    %9 = vector.broadcast %8 : vector<1x512xf32> to vector<32x512xf32>
    %10 = arith.addf %6, %9 : vector<32x512xf32>
    %11 = vector.extract_strided_slice %10 {offsets = [0, 0], sizes = [32, 256], strides = [1, 1]} : vector<32x512xf32> to vector<32x256xf32>
    %12 = vector.extract_strided_slice %10 {offsets = [0, 256], sizes = [32, 256], strides = [1, 1]} : vector<32x512xf32> to vector<32x256xf32>
    %13 = arith.negf %11 : vector<32x256xf32>
    %14 = math.exp %13 : vector<32x256xf32>
    %cst_8 = arith.constant 1.000000e+00 : f32
    %15 = vector.broadcast %cst_8 : f32 to vector<32x256xf32>
    %16 = arith.addf %15, %14 : vector<32x256xf32>
    %17 = arith.divf %15, %16 : vector<32x256xf32>
    %18 = arith.mulf %11, %17 : vector<32x256xf32>
    %19 = arith.mulf %18, %12 : vector<32x256xf32>
    %c0_9 = arith.constant 0 : index
    %c0_10 = arith.constant 0 : index
    %20 = vector.load %arg8[%c0_9, %c0_10] : memref<32x128xf32, #tpu.memory_space<vmem>>, vector<32x128xf32>
    %21 = arith.truncf %19 : vector<32x256xf32> to vector<32x256xbf16>
    %c0_11 = arith.constant 0 : index
    %c0_12 = arith.constant 0 : index
    %22 = vector.load %arg5[%c0_11, %c0_12] : memref<256x128xbf16, #tpu.memory_space<vmem>>, vector<256x128xbf16>
    %cst_13 = arith.constant dense<0.000000e+00> : vector<32x128xf32>
    %23 = tpu.matmul %21, %22, %cst_13 {dimension_numbers = #tpu.dot_dimension_numbers<[1], [0], [0], [1], [0, 0, 1, 1], [], []>} : vector<32x256xbf16>, vector<256x128xbf16>, vector<32x128xf32> -> vector<32x128xf32>
    %24 = arith.addf %20, %23 : vector<32x128xf32>
    %c0_14 = arith.constant 0 : index
    %c0_15 = arith.constant 0 : index
    %25 = vector.load %arg8[%c0_14, %c0_15] : memref<32x128xf32, #tpu.memory_space<vmem>>, vector<32x128xf32>
    tpu.vector_store %arg8[%c0_14, %c0_15], %24 {strides = array<i32>} : memref<32x128xf32, #tpu.memory_space<vmem>>, vector<32x128xf32>,
    %c0_i32_16 = arith.constant 0 : i32
    %26 = arith.cmpi eq, %arg1, %c0_i32_16 : i32
    %27 = arith.extui %26 : i1 to i32
    %c0_i32_17 = arith.constant 0 : i32
    %28 = arith.cmpi ne, %27, %c0_i32_17 : i32
    scf.if %28 {
      %c0_18 = arith.constant 0 : index
      %c0_19 = arith.constant 0 : index
      %29 = vector.load %arg8[%c0_18, %c0_19] : memref<32x128xf32, #tpu.memory_space<vmem>>, vector<32x128xf32>
      %c0_20 = arith.constant 0 : index
      %c0_21 = arith.constant 0 : index
      %30 = vector.load %arg7[%c0_20, %c0_21] : memref<32x128xf32, #tpu.memory_space<vmem>>, vector<32x128xf32>
      tpu.vector_store %arg7[%c0_20, %c0_21], %29 {strides = array<i32>} : memref<32x128xf32, #tpu.memory_space<vmem>>, vector<32x128xf32>,
    } else {
    }
    return
  }
  func.func @transform_0(%arg0: i32, %arg1: i32) -> (i32, i32) {
    %c0_i32 = arith.constant 0 : i32
    %c0_i32_0 = arith.constant 0 : i32
    return %arg0, %c0_i32 : i32, i32
  }
  func.func @transform_1(%arg0: i32, %arg1: i32) -> (i32, i32, i32) {
    %c0_i32 = arith.constant 0 : i32
    %c0_i32_0 = arith.constant 0 : i32
    %c0_i32_1 = arith.constant 0 : i32
    return %arg1, %c0_i32, %c0_i32_0 : i32, i32, i32
  }
  func.func @transform_2(%arg0: i32, %arg1: i32) -> (i32, i32, i32) {
    %c0_i32 = arith.constant 0 : i32
    %c0_i32_0 = arith.constant 0 : i32
    %c0_i32_1 = arith.constant 0 : i32
    return %arg1, %c0_i32, %c0_i32_0 : i32, i32, i32
  }
  func.func @transform_3(%arg0: i32, %arg1: i32) -> (i32, i32) {
    %c0_i32 = arith.constant 0 : i32
    %c0_i32_0 = arith.constant 0 : i32
    return %arg1, %c0_i32 : i32, i32
  }
  func.func @transform_4(%arg0: i32, %arg1: i32) -> (i32, i32) {
    %c0_i32 = arith.constant 0 : i32
    %c0_i32_0 = arith.constant 0 : i32
    %c0_i32_1 = arith.constant 0 : i32
    return %c0_i32, %c0_i32_0 : i32, i32
  }
  func.func @transform_5(%arg0: i32, %arg1: i32) -> (i32, i32) {
    %c0_i32 = arith.constant 0 : i32
    %c0_i32_0 = arith.constant 0 : i32
    return %arg0, %c0_i32 : i32, i32
  }
}

</mosaic_0001>

<bundles_post_ra>
// kernel: tpu_custom_call.1
= control target key start
LH: loop header
LB: loop body
LE: loop exit
PB: predicated region body
PF: predicated region fallthrough
CT: control target
= control target key end

     0   :  { %10 = vsyncpa [#allocation4], 0  ;;  %s1138_s0 = inlined_call_operand.hbm [shape: bf16[32,128], index: 0, kind: input, shape index: {}]   ;;  %s1139_s1 = inlined_call_operand.hbm [shape: bf16[1,128,512], index: 1, kind: input, shape index: {}]   ;;  %s1140_s2 = inlined_call_operand.hbm [shape: f32[1,1,512], index: 2, kind: input, shape index: {}]   ;;  %s1141_s3 = inlined_call_operand.hbm [shape: bf16[256,128], index: 3, kind: input, shape index: {}]   ;;  %s1142_s4 = inlined_call_operand.vmem [shape: f32[1,128], index: 4, kind: input, shape index: {}]   ;;  %s1143_s5 = inlined_call_operand.hbm [shape: f32[32,128], index: 5, kind: output, shape index: {}]  }
   0x1   :  { %11 = vsyncpa [#allocation7], 0 }
   0x2   :  { %12 = vsyncpa [#allocation10], 0 }
   0x3   :  { %13 = vsyncpa [#allocation5], 0  ;;  %s1034_s18 = smov [#allocation6]  }
   0x4   :  { %s31_s19 = sshll.u32 %s1034_s18, 4  ;;  %s32_s19 = int_to_ptr.vmem [resolvable:$true] %s31_s19 }
   0x5   :  { %s934_s20 = scalar_lea.vmem %s32_s19, 4096  ;;  %p939_p1 = scmp.lt.s32.totalorder %s32_s19, %s32_s19 }
   0x6   :  { %p935_p0 = scmp.ne.s32.totalorder %s32_s19, %s934_s20  ;;  %p940_p2 = scmp.lt.s32.totalorder %s934_s20, %s934_s20 }
   0x8   :  { %p941_p3 = por %p940_p2, %p939_p1 }
   0xa   :  { %p942_p4 = pnand %p941_p3, %p935_p0 }
   0xc   :  { %945 = shalt.err (!%p942_p4)
}
   0xd   :  { %s1035_s21 = smov 256   ;;  %s1036_s22 = smov 16  }
   0xe   :  { %37 = dma.hbm_to_vmem [thread:$0]  %s1139_s1, 4096, %s32_s19, [#allocation7], %s1035_s21, %s1035_s21, %s1036_s22  }
   0xf   :  { %s1037_s25 = smov [#allocation3]  }
  0x10   :  { %s19_s26 = sshll.u32 %s1037_s25, 4  ;;  %s20_s26 = int_to_ptr.vmem [resolvable:$true] %s19_s26 }
  0x11   :  { %s954_s27 = scalar_lea.vmem %s20_s26, 256  ;;  %p959_p6 = scmp.lt.s32.totalorder %s20_s26, %s20_s26 }
  0x12   :  { %p955_p5 = scmp.ne.s32.totalorder %s20_s26, %s954_s27  ;;  %p960_p7 = scmp.lt.s32.totalorder %s954_s27, %s954_s27 }
  0x14   :  { %p961_p8 = por %p960_p7, %p959_p6 }
  0x16   :  { %p962_p9 = pnand %p961_p8, %p955_p5 }
  0x18   :  { %965 = shalt.err (!%p962_p9)
}
  0x19   :  { %s1038_s28 = smov 64   ;;  %s1039_s29 = smov 4  }
  0x1a   :  { %25 = dma.hbm_to_vmem [thread:$0]  %s1138_s0, 256, %s20_s26, [#allocation4], %s1038_s28, %s1038_s28, %s1039_s29  }
  0x1b   :  { %s1040_s7 = smov [#allocation8]   ;;  %s1041_s9 = smov [#allocation9]  }
  0x1c   :  { %s44_s8 = sshll.u32 %s1040_s7, 4  ;;  %s53_s1 = sshll.u32 %s1041_s9, 4  ;;  %s45_s8 = int_to_ptr.vmem [resolvable:$true] %s44_s8  ;;  %s54_s1 = int_to_ptr.vmem [resolvable:$true] %s53_s1 }
  0x1d   :  { %s974_s10 = scalar_lea.vmem %s45_s8, 64  ;;  %p979_p11 = scmp.lt.s32.totalorder %s45_s8, %s45_s8 }
  0x1e   :  { %p975_p10 = scmp.ne.s32.totalorder %s45_s8, %s974_s10  ;;  %p980_p12 = scmp.lt.s32.totalorder %s974_s10, %s974_s10 }
  0x20   :  { %p981_p13 = por %p980_p12, %p979_p11 }
  0x22   :  { %p982_p0 = pnand %p981_p13, %p975_p10 }
  0x24   :  { %985 = shalt.err (!%p982_p0)
}
  0x25   :  { %47 = dma.hbm_to_vmem [thread:$0]  %s1140_s2, 64, %s45_s8, [#allocation7]  }
  0x26   :  { %s994_s13 = scalar_lea.vmem %s54_s1, 2048  ;;  %p999_p2 = scmp.lt.s32.totalorder %s54_s1, %s54_s1 }
  0x27   :  { %p995_p1 = scmp.ne.s32.totalorder %s54_s1, %s994_s13  ;;  %p1000_p3 = scmp.lt.s32.totalorder %s994_s13, %s994_s13 }
  0x29   :  { %p1001_p4 = por %p1000_p3, %p999_p2 }
  0x2b   :  { %p1002_p5 = pnand %p1001_p4, %p995_p1 }
  0x2d   :  { %1005 = shalt.err (!%p1002_p5)
}
  0x2e   :  { %59 = dma.hbm_to_vmem [thread:$0]  %s1141_s3, 2048, %s54_s1, [#allocation10], %s1038_s28, %s1038_s28, %s1039_s29  }
  0x2f   :  { %1026 = dma.done.wait [#allocation4], 256  }
  0x30   :  { %1027 = vsyncadd [#allocation4], 4294967040 }
  0x31   :  { %1028 = dma.done.wait [#allocation7], 4160  }
  0x32   :  { %1029 = vsyncadd [#allocation7], 4294963136 }
  0x33   :  { %1030 = dma.done.wait [#allocation10], 2048  }
  0x34   :  { %1031 = vsyncadd [#allocation10], 4294965248  ;;  %v1042_v0 = vmov 0   ;;  %v828_v1 = vld [vmem:[#allocation6 + $0xe4] ss:$16 sps:$4 sm:$0xff]   ;;  %v862_v33 = vld [vmem:[#allocation3 + $0x8] sm:$0xff]   ;;  %v128_v51 = vlaneseq }
  0x35   :  { %352 = vmatprep.mubr.bf16.mxu0 %v1042_v0  ;;  %405 = vmatprep.mubr.bf16.mxu1 %v1042_v0  ;;  %v830_v2 = vld [vmem:[#allocation6 + $0xe0] ss:$16 sps:$4 sm:$0xff]   ;;  %v831_v3 = vld [vmem:[#allocation6 + $0xc4] ss:$16 sps:$4 sm:$0xff]   ;;  %v851_v9 = vld [vmem:[#allocation6 + $0xec] ss:$16 sps:$4 sm:$0xff]  }
  0x36   :  { %320 = vmatprep.subr.bf16.mxu0 %v828_v1  ;;  %v833_v4 = vld [vmem:[#allocation6 + $0xc0] ss:$16 sps:$4 sm:$0xff]   ;;  %v834_v5 = vld [vmem:[#allocation6 + $0xa4] ss:$16 sps:$4 sm:$0xff]   ;;  %v854_v10 = vld [vmem:[#allocation6 + $0xe8] ss:$16 sps:$4 sm:$0xff]   ;;  %373 = vmatprep.subr.bf16.mxu1 %v851_v9 }
  0x37   :  { %321 = vmatpush1.bf16.msra.mxu0 %v830_v2  ;;  %v836_v6 = vld [vmem:[#allocation6 + $0xa0] ss:$16 sps:$4 sm:$0xff]   ;;  %v837_v7 = vld [vmem:[#allocation6 + $0x84] ss:$16 sps:$4 sm:$0xff]   ;;  %v856_v12 = vld [vmem:[#allocation6 + $0xcc] ss:$16 sps:$4 sm:$0xff]   ;;  %374 = vmatpush1.bf16.msra.mxu1 %v854_v10 }
  0x38   :  { %322 = vmatprep.subr.bf16.mxu0 %v831_v3  ;;  %v839_v8 = vld [vmem:[#allocation6 + $0x80] ss:$16 sps:$4 sm:$0xff]   ;;  %v840_v11 = vld [vmem:[#allocation6 + $0x64] ss:$16 sps:$4 sm:$0xff]   ;;  %v858_v13 = vld [vmem:[#allocation6 + $0xc8] ss:$16 sps:$4 sm:$0xff]   ;;  %375 = vmatprep.subr.bf16.mxu1 %v856_v12 }
  0x39   :  { %v842_v14 = vld [vmem:[#allocation6 + $0x60] ss:$16 sps:$4 sm:$0xff]   ;;  %v859_v15 = vld [vmem:[#allocation6 + $0xac] ss:$16 sps:$4 sm:$0xff]   ;;  %v843_v16 = vld [vmem:[#allocation6 + $0x44] ss:$16 sps:$4 sm:$0xff]  }
  0x3a   :  { %v845_v17 = vld [vmem:[#allocation6 + $0x40] ss:$16 sps:$4 sm:$0xff]   ;;  %v861_v18 = vld [vmem:[#allocation6 + $0xa8] ss:$16 sps:$4 sm:$0xff]   ;;  %v863_v19 = vld [vmem:[#allocation6 + $0x8c] ss:$16 sps:$4 sm:$0xff]  }
  0x3b   :  { %323 = vmatpush1.bf16.msra.mxu0 %v833_v4  ;;  %376 = vmatpush1.bf16.msra.mxu1 %v858_v13  ;;  %v846_v20 = vld [vmem:[#allocation6 + $0x24] ss:$16 sps:$4 sm:$0xff]   ;;  %v848_v21 = vld [vmem:[#allocation6 + $0x20] ss:$16 sps:$4 sm:$0xff]   ;;  %v865_v22 = vld [vmem:[#allocation6 + $0x88] ss:$16 sps:$4 sm:$0xff]  }
  0x3c   :  { %324 = vmatprep.subr.bf16.mxu0 %v834_v5  ;;  %377 = vmatprep.subr.bf16.mxu1 %v859_v15  ;;  %v849_v23 = vld [vmem:[#allocation6 + $0x4] ss:$16 sps:$4 sm:$0xff]   ;;  %v866_v24 = vld [vmem:[#allocation6 + $0x6c] ss:$16 sps:$4 sm:$0xff]   ;;  %v868_v25 = vld [vmem:[#allocation6 + $0x68] ss:$16 sps:$4 sm:$0xff]  }
  0x3d   :  { %v853_v26 = vld [vmem:[#allocation6] ss:$16 sps:$4 sm:$0xff]   ;;  %v869_v27 = vld [vmem:[#allocation6 + $0x4c] ss:$16 sps:$4 sm:$0xff]   ;;  %v871_v29 = vld [vmem:[#allocation6 + $0x48] ss:$16 sps:$4 sm:$0xff]  }
  0x3e   :  { %v855_v28 = vld [vmem:[#allocation3] sm:$0xff]   ;;  %v872_v30 = vld [vmem:[#allocation6 + $0x2c] ss:$16 sps:$4 sm:$0xff]   ;;  %v874_v31 = vld [vmem:[#allocation6 + $0x28] ss:$16 sps:$4 sm:$0xff]   ;;  %v1092_v52 = vshrl.u32 %v128_v51, 7 }
  0x3f   :  { %325 = vmatpush1.bf16.msra.mxu0 %v836_v6  ;;  %378 = vmatpush1.bf16.msra.mxu1 %v861_v18  ;;  %v875_v32 = vld [vmem:[#allocation6 + $0xc] ss:$16 sps:$4 sm:$0xff]   ;;  %v877_v34 = vld [vmem:[#allocation6 + $0x8] ss:$16 sps:$4 sm:$0xff]   ;;  %v1095_v54 = vld [vmem:[#allocation8] sm:$0xf] }
  0x40   :  { %326 = vmatprep.subr.bf16.mxu0 %v837_v7  ;;  %379 = vmatprep.subr.bf16.mxu1 %v863_v19  ;;  %v878_v35 = vld [vmem:[#allocation9 + $0x78] sm:$0xff]   ;;  %v880_v37 = vld [vmem:[#allocation9 + $0x70] sm:$0xff]   ;;  %v882_v39 = vld [vmem:[#allocation9 + $0x68] sm:$0xff]   ;;  %v130_v53 = vsub.s32 0, %v1092_v52  ;;  %v134_v55 = vsub.s32 1, %v1092_v52  ;;  %s1043_s15 = smov [#allocation11]  }
  0x41   :  { %v879_v36 = vld [vmem:[#allocation9 + $0x38] sm:$0xff]   ;;  %v881_v38 = vld [vmem:[#allocation9 + $0x30] sm:$0xff]   ;;  %v883_v40 = vld [vmem:[#allocation9 + $0x28] sm:$0xff]   ;;  %s699_s16 = sshll.u32 %s1043_s15, 4  ;;  %s700_s16 = int_to_ptr.vmem [resolvable:$true] %s699_s16 }
  0x42   :  { %v884_v41 = vld [vmem:[#allocation9 + $0x60] sm:$0xff]   ;;  %v886_v43 = vld [vmem:[#allocation9 + $0x58] sm:$0xff]   ;;  %v888_v45 = vld [vmem:[#allocation9 + $0x50] sm:$0xff]   ;;  %v131_v56 = vrot.slane %v1095_v54, %v130_v53  ;;  %v135_v57 = vrot.slane %v1095_v54, %v134_v55  ;;  %p1011_p7 = scmp.lt.s32.totalorder %s700_s16, %s700_s16 }
  0x43   :  { %327 = vmatpush1.bf16.msra.mxu0 %v839_v8  ;;  %380 = vmatpush1.bf16.msra.mxu1 %v865_v22  ;;  %v885_v42 = vld [vmem:[#allocation9 + $0x20] sm:$0xff]   ;;  %v887_v44 = vld [vmem:[#allocation9 + $0x18] sm:$0xff]   ;;  %v889_v46 = vld [vmem:[#allocation9 + $0x10] sm:$0xff]  }
  0x44   :  { %328 = vmatprep.subr.bf16.mxu0 %v840_v11  ;;  %381 = vmatprep.subr.bf16.mxu1 %v866_v24  ;;  %v890_v47 = vld [vmem:[#allocation9 + $0x48] sm:$0xff]   ;;  %v892_v49 = vld [vmem:[#allocation9 + $0x40] sm:$0xff]  }
  0x45   :  { %v891_v48 = vld [vmem:[#allocation9 + $0x8] sm:$0xff]   ;;  %v893_v50 = vld [vmem:[#allocation9] sm:$0xff]  }
  0x47   :  { %329 = vmatpush1.bf16.msra.mxu0 %v842_v14  ;;  %382 = vmatpush1.bf16.msra.mxu1 %v868_v25 }
  0x48   :  { %330 = vmatprep.subr.bf16.mxu0 %v843_v16  ;;  %383 = vmatprep.subr.bf16.mxu1 %v869_v27 }
  0x4b   :  { %331 = vmatpush1.bf16.msra.mxu0 %v845_v17  ;;  %384 = vmatpush1.bf16.msra.mxu1 %v871_v29 }
  0x4c   :  { %332 = vmatprep.subr.bf16.mxu0 %v846_v20  ;;  %385 = vmatprep.subr.bf16.mxu1 %v872_v30 }
  0x4f   :  { %333 = vmatpush1.bf16.msra.mxu0 %v848_v21  ;;  %386 = vmatpush1.bf16.msra.mxu1 %v874_v31 }
  0x50   :  { %334 = vmatprep.subr.bf16.mxu0 %v849_v23  ;;  %387 = vmatprep.subr.bf16.mxu1 %v875_v32 }
  0x53   :  { %335 = vmatpush1.bf16.msra.mxu0 %v853_v26  ;;  %388 = vmatpush1.bf16.msra.mxu1 %v877_v34 }
  0x54   :  { %772 = vmatprep.subr.bf16.mxu0 %v878_v35  ;;  %800 = vmatprep.subr.bf16.mxu1 %v878_v35 }
  0x56   :  { %353 = vmatmul.mubr.bf16.vlgmr.msra.gmra.mxu0 %v855_v28  ;;  %406 = vmatmul.mubr.bf16.vlgmr.msra.gmra.mxu1 %v855_v28 }
  0x57   :  { %362 = vmatprep.mubr.bf16.mxu0 %v1042_v0  ;;  %415 = vmatprep.mubr.bf16.mxu1 %v1042_v0 }
  0x58   :  { %773 = vmatpush3.bf16.msra.mxu0 %v879_v36  ;;  %808 = vmatpush3.bf16.msra.mxu1 %v879_v36 }
  0x59   :  { %774 = vmatprep.subr.bf16.mxu0 %v880_v37  ;;  %801 = vmatprep.subr.bf16.mxu1 %v880_v37  ;;  %v138_v37 = vsub.s32 2, %v1092_v52 }
  0x5c   :  { %775 = vmatpush3.bf16.msra.mxu0 %v881_v38  ;;  %809 = vmatpush3.bf16.msra.mxu1 %v881_v38 }
  0x5d   :  { %776 = vmatprep.subr.bf16.mxu0 %v882_v39  ;;  %802 = vmatprep.subr.bf16.mxu1 %v882_v39  ;;  %v142_v39 = vsub.s32 3, %v1092_v52 }
  0x5e   :  { %363 = vmatmul.mubr.bf16.gmra.mxu0 %v862_v33  ;;  %416 = vmatmul.mubr.bf16.gmra.mxu1 %v862_v33 }
  0x60   :  { %777 = vmatpush3.bf16.msra.mxu0 %v883_v40  ;;  %810 = vmatpush3.bf16.msra.mxu1 %v883_v40 }
  0x61   :  { %778 = vmatprep.subr.bf16.mxu0 %v884_v41  ;;  %803 = vmatprep.subr.bf16.mxu1 %v884_v41 }
  0x64   :  { %779 = vmatpush3.bf16.msra.mxu0 %v885_v42  ;;  %811 = vmatpush3.bf16.msra.mxu1 %v885_v42  ;;  %v139_v42 = vrot.slane %v1095_v54, %v138_v37 }
  0x65   :  { %780 = vmatprep.subr.bf16.mxu0 %v886_v43  ;;  %804 = vmatprep.subr.bf16.mxu1 %v886_v43 }
  0x68   :  { %781 = vmatpush3.bf16.msra.mxu0 %v887_v44  ;;  %812 = vmatpush3.bf16.msra.mxu1 %v887_v44  ;;  %v143_v44 = vrot.slane %v1095_v54, %v142_v39 }
  0x69   :  { %782 = vmatprep.subr.bf16.mxu0 %v888_v45  ;;  %805 = vmatprep.subr.bf16.mxu1 %v888_v45 }
  0x6c   :  { %783 = vmatpush3.bf16.msra.mxu0 %v889_v46  ;;  %813 = vmatpush3.bf16.msra.mxu1 %v889_v46 }
  0x6d   :  { %784 = vmatprep.subr.bf16.mxu0 %v890_v47  ;;  %806 = vmatprep.subr.bf16.mxu1 %v890_v47 }
  0x70   :  { %785 = vmatpush3.bf16.msra.mxu0 %v891_v48  ;;  %814 = vmatpush3.bf16.msra.mxu1 %v891_v48 }
  0x71   :  { %786 = vmatprep.subr.bf16.mxu0 %v892_v49  ;;  %807 = vmatprep.subr.bf16.mxu1 %v892_v49 }
  0x74   :  { %787 = vmatpush3.bf16.msra.mxu0 %v893_v50  ;;  %815 = vmatpush3.bf16.msra.mxu1 %v893_v50 }
 0x116   :  { %v354_v58 = vpop.f32.mrf.mxu0  ;;  %v407_v19 = vpop.f32.mrf.mxu1 }
 0x117   :  { %v1100_v59 = vadd.f32 %v354_v58, %v131_v56  ;;  %v408_v51 = vadd.f32 %v407_v19, %v139_v42 }
 0x118   :  { %v356_v60 = vpop.f32.mrf.mxu0  ;;  %v409_v24 = vpop.f32.mrf.mxu1 }
 0x119   :  { %v748_v61 = vmul.f32 -1.442695, %v1100_v59  ;;  %v1103_v62 = vadd.f32 %v356_v60, %v135_v57  ;;  %v410_v55 = vadd.f32 %v409_v24, %v143_v44 }
 0x11a   :  { %v358_v63 = vpop.f32.mrf.mxu0  ;;  %v411_v29 = vpop.f32.mrf.mxu1 }
 0x11b   :  { %894 = vpow2.f32 %v748_v61  ;;  %v749_v0 = vmul.f32 -1.442695, %v1103_v62  ;;  %v359_v1 = vadd.f32 %v358_v63, %v131_v56  ;;  %v412_v53 = vadd.f32 %v411_v29, %v139_v42 }
 0x11c   :  { %v360_v2 = vpop.f32.mrf.mxu0  ;;  %v413_v34 = vpop.f32.mrf.mxu1 }
 0x11d   :  { %896 = vpow2.f32 %v749_v0  ;;  %v750_v3 = vmul.f32 -1.442695, %v359_v1  ;;  %v1106_v4 = vadd.f32 %v360_v2, %v135_v57 }
 0x11e   :  { %v364_v5 = vpop.f32.mrf.mxu0  ;;  %v417_v40 = vpop.f32.mrf.mxu1 }
 0x11f   :  { %898 = vpow2.f32 %v750_v3  ;;  %v751_v6 = vmul.f32 -1.442695, %v1106_v4  ;;  %v1109_v7 = vadd.f32 %v364_v5, %v131_v56 }
 0x120   :  { %v366_v8 = vpop.f32.mrf.mxu0  ;;  %v419_v46 = vpop.f32.mrf.mxu1 }
 0x121   :  { %900 = vpow2.f32 %v751_v6  ;;  %v752_v9 = vmul.f32 -1.442695, %v1109_v7  ;;  %v1112_v10 = vadd.f32 %v366_v8, %v135_v57  ;;  %v418_v8 = vadd.f32 %v417_v40, %v139_v42 }
 0x122   :  { %v368_v11 = vpop.f32.mrf.mxu0  ;;  %v421_v58 = vpop.f32.mrf.mxu1 }
 0x123   :  { %902 = vpow2.f32 %v752_v9  ;;  %v753_v12 = vmul.f32 -1.442695, %v1112_v10  ;;  %v1115_v13 = vadd.f32 %v368_v11, %v131_v56  ;;  %v414_v56 = vadd.f32 %v413_v34, %v143_v44 }
 0x124   :  { %v370_v14 = vpop.f32.mrf.mxu0  ;;  %v422_v9 = vadd.f32 %v421_v58, %v139_v42 }
 0x125   :  { %904 = vpow2.f32 %v753_v12  ;;  %v754_v15 = vmul.f32 -1.442695, %v1115_v13  ;;  %v1118_v16 = vadd.f32 %v370_v14, %v135_v57  ;;  %v420_v12 = vadd.f32 %v419_v46, %v143_v44 }
 0x127   :  { %906 = vpow2.f32 %v754_v15  ;;  %v755_v17 = vmul.f32 -1.442695, %v1118_v16 }
 0x128   :  { %v895_v18 = vpop.eup %894 }
 0x129   :  { %908 = vpow2.f32 %v755_v17  ;;  %v450_v21 = vadd.f32 1.0, %v895_v18 }
 0x12a   :  { %v897_v20 = vpop.eup %896 }
 0x12b   :  { %v451_v22 = vadd.f32 1.0, %v897_v20 }
 0x12c   :  { %v899_v23 = vpop.eup %898 }
 0x12d   :  { %910 = vrcp.f32 %v451_v22  ;;  %v452_v25 = vadd.f32 1.0, %v899_v23 }
 0x12e   :  { %v901_v26 = vpop.eup %900  ;;  %912 = vrcp.f32 %v450_v21 }
 0x12f   :  { %914 = vrcp.f32 %v452_v25  ;;  %v453_v27 = vadd.f32 1.0, %v901_v26 }
 0x130   :  { %v903_v28 = vpop.eup %902 }
 0x131   :  { %916 = vrcp.f32 %v453_v27  ;;  %v454_v31 = vadd.f32 1.0, %v903_v28 }
 0x132   :  { %v905_v30 = vpop.eup %904 }
 0x133   :  { %v455_v32 = vadd.f32 1.0, %v905_v30 }
 0x134   :  { %v907_v33 = vpop.eup %906 }
 0x135   :  { %918 = vrcp.f32 %v455_v32  ;;  %v456_v35 = vadd.f32 1.0, %v907_v33 }
 0x136   :  { %v909_v36 = vpop.eup %908  ;;  %920 = vrcp.f32 %v454_v31 }
 0x137   :  { %922 = vrcp.f32 %v456_v35  ;;  %v457_v38 = vadd.f32 1.0, %v909_v36 }
 0x139   :  { %924 = vrcp.f32 %v457_v38 }
 0x13a   :  { %v911_v41 = vpop.eup %910 }
 0x13b   :  { %v913_v43 = vpop.eup %912  ;;  %v475_v47 = vmul.f32 %v911_v41, %v1103_v62 }
 0x13c   :  { %v915_v45 = vpop.eup %914  ;;  %v474_v50 = vmul.f32 %v913_v43, %v1100_v59 }
 0x13d   :  { %v476_v48 = vmul.f32 %v915_v45, %v359_v1  ;;  %v483_v60 = vmul.f32 %v475_v47, %v410_v55  ;;  %v423_v1 = vpop.f32.mrf.mxu1 }
 0x13e   :  { %v917_v49 = vpop.eup %916  ;;  %v482_v54 = vmul.f32 %v474_v50, %v408_v51  ;;  %v424_v14 = vadd.f32 %v423_v1, %v143_v44 }
 0x13f   :  { %v477_v52 = vmul.f32 %v917_v49, %v1106_v4  ;;  %v484_v57 = vmul.f32 %v476_v48, %v412_v53 }
 0x141   :  { %v485_v61 = vmul.f32 %v477_v52, %v414_v56  ;;  %v494_v62 = vpack.c.bf16 %v484_v57, %v482_v54 }
 0x142   :  { %v919_v63 = vpop.eup %918 }
 0x143   :  { %v921_v0 = vpop.eup %920  ;;  %v495_v2 = vpack.c.bf16 %v485_v61, %v483_v60  ;;  %v479_v5 = vmul.f32 %v919_v63, %v1112_v10 }
 0x144   :  { %v923_v3 = vpop.eup %922  ;;  %v478_v4 = vmul.f32 %v921_v0, %v1109_v7  ;;  %v713_v7 = vld [vmem:[%s1142_s4] ss:$0 sm:$0xff]  ;;  %s1006_s4 = scalar_lea.vmem %s700_s16, 512 }
 0x145   :  { %v480_v59 = vmul.f32 %v923_v3, %v1115_v13  ;;  %658 = vmatprep.mubr.bf16.mxu0 %v495_v2  ;;  %v487_v17 = vmul.f32 %v479_v5, %v420_v12  ;;  %p1007_p6 = scmp.ne.s32.totalorder %s700_s16, %s1006_s4  ;;  %p1012_p8 = scmp.lt.s32.totalorder %s1006_s4, %s1006_s4 }
 0x146   :  { %v925_v6 = vpop.eup %924  ;;  %659 = vmatmul.mubr.bf16.vlgmr.msra.gmra.mxu0 %v494_v62  ;;  %v486_v19 = vmul.f32 %v478_v4, %v418_v8 }
 0x147   :  { %v481_v11 = vmul.f32 %v925_v6, %v1118_v16  ;;  %v488_v15 = vmul.f32 %v480_v59, %v422_v9  ;;  %p1013_p9 = por %p1012_p8, %p1011_p7 }
 0x149   :  { %v489_v18 = vmul.f32 %v481_v11, %v424_v14  ;;  %v496_v21 = vpack.c.bf16 %v488_v15, %v486_v19  ;;  %p1014_p10 = pnand %p1013_p9, %p1007_p6 }
 0x14b   :  { %v497_v20 = vpack.c.bf16 %v489_v18, %v487_v17 }
 0x14d   :  { %666 = vmatprep.mubr.bf16.mxu1 %v497_v20 }
 0x14e   :  { %667 = vmatmul.mubr.bf16.vlgmr.msra.gmra.mxu1 %v496_v21 }
 0x206   :  { %v788_v10 = vpop.f32.mrf.mxu0 }
 0x208   :  { %v789_v13 = vpop.f32.mrf.mxu0 }
 0x209   :  { %v790_v22 = vadd.f32 %v789_v13, %v788_v10 }
 0x20a   :  { %v791_v23 = vpop.f32.mrf.mxu0 }
 0x20b   :  { %v675_v24 = vadd.f32 %v790_v22, %v713_v7 }
 0x20c   :  { %v792_v16 = vpop.f32.mrf.mxu0 }
 0x20d   :  { %690 = vst [vmem:[#allocation11] sm:$0xff] %v675_v24  ;;  %v793_v25 = vadd.f32 %v792_v16, %v791_v23 }
 0x20e   :  { %v794_v26 = vpop.f32.mrf.mxu1 }
 0x20f   :  { %v676_v27 = vadd.f32 %v793_v25, %v713_v7 }
 0x210   :  { %v795_v28 = vpop.f32.mrf.mxu1 }
 0x211   :  { %691 = vst [vmem:[#allocation11 + $0x8] sm:$0xff] %v676_v27  ;;  %v796_v29 = vadd.f32 %v795_v28, %v794_v26 }
 0x212   :  { %v797_v30 = vpop.f32.mrf.mxu1 }
 0x213   :  { %v677_v31 = vadd.f32 %v796_v29, %v713_v7 }
 0x214   :  { %v798_v32 = vpop.f32.mrf.mxu1 }
 0x215   :  { %692 = vst [vmem:[#allocation11 + $0x10] sm:$0xff] %v677_v31  ;;  %v799_v33 = vadd.f32 %v798_v32, %v797_v30 }
 0x217   :  { %v678_v34 = vadd.f32 %v799_v33, %v713_v7 }
 0x219   :  { %693 = vst [vmem:[#allocation11 + $0x18] sm:$0xff] %v678_v34 }
 0x21a   :  { %1017 = shalt.err (!%p1014_p10)
}
 0x21b   :  { %s1044_s17 = smov 128   ;;  %s1045_s18 = smov 8  }
 0x21c   :  { %705 = dma.vmem_to_hbm [thread:$0]  %s700_s16, 512, %s1143_s5, [#allocation5], %s1044_s17, %s1044_s17, %s1045_s18  }
 0x21d   :  { %1032 = dma.done.wait [#allocation5], 512  }
 0x21e   :  { %1033 = vsyncadd [#allocation5], 4294966784 }
 0x21f   :  { %709 = vsyncpa [#allocation4], 1 }
 0x220   :  { %710 = vsyncpa [#allocation7], 1 }
 0x221   :  { %711 = vsyncpa [#allocation10], 1 }
 0x222   :  { %712 = vsyncpa [#allocation5], 1 }

</bundles_post_ra>
